<compile_context>
chip_gen: v5e
topology: v5e:2x2
jax: 0.10.0
libtpu: 0.0.40
codegen_flags: <defaults>
</compile_context>

<pallas_src>
import math

import numpy as np
import jax
import jax.numpy as jnp
from jax.experimental import pallas as pl
from jax.experimental.pallas import tpu as pltpu


def _round_up(x, m):
    return ((x + m - 1) // m) * m


def cp_linear_kernel(x_ref, k_ref, lt_ref, b_ref, o_ref):
    """Hot path: factorized matmul chain + bias add.

    x_ref  : (TB, x_in)   streamed activation tile
    k_ref  : (x_in, Rp)   Khatri-Rao of input-mode factors, CP weights folded in
    lt_ref : (Rp, TN)     Khatri-Rao of output-mode factors (transposed) tile
    b_ref  : (1, TN)      bias tile
    o_ref  : (TB, TN)     output tile
    """
    t = jnp.dot(x_ref[...], k_ref[...], preferred_element_type=jnp.float32)   # (TB, Rp)
    out = jnp.dot(t, lt_ref[...], preferred_element_type=jnp.float32)         # (TB, TN)
    o_ref[...] = (out + b_ref[...]).astype(o_ref.dtype)


def khatri_rao(a, b):
    # column-wise Kronecker product: (m, R), (n, R) -> (m*n, R)
    m, r = a.shape
    n, _ = b.shape
    return (a[:, None, :] * b[None, :, :]).reshape(m * n, r)


def tensorized_linear_cp_forward(x, factors_in, factors_out, cp_weights, bias,
                                 *, tb_max=256, tn_max=256):
    in_features = int(np.prod([f.shape[0] for f in factors_in]))
    out_features = int(np.prod([f.shape[0] for f in factors_out]))

    B, x_in = x.shape
    assert x_in <= in_features, "input feature dim larger than in_features"

    # ---- parameter-side prep (batch independent), always in f32 -------------
    K = factors_in[0].astype(jnp.float32)
    for f in factors_in[1:]:
        K = khatri_rao(K, f.astype(jnp.float32))           # (in_features, R)
    L = factors_out[0].astype(jnp.float32)
    for f in factors_out[1:]:
        L = khatri_rao(L, f.astype(jnp.float32))            # (out_features, R)

    # fold CP weights into K; replace x zero-padding with a row slice of K
    K = K * cp_weights.astype(jnp.float32)[None, :]
    K = K[:x_in, :]
    R = K.shape[1]

    # ---- alignment / tiling --------------------------------------------------
    Rp = _round_up(R, 128)                                   # MXU-aligned rank
    TN = min(_round_up(out_features, 128), tn_max)           # lane-dense output tile
    Np = _round_up(out_features, TN)
    TB = min(_round_up(B, 8), tb_max)                        # sublane-aligned batch tile
    Bp = _round_up(B, TB)

    Kp = jnp.zeros((x_in, Rp), jnp.float32).at[:, :R].set(K)
    Ltp = jnp.zeros((Rp, Np), jnp.float32).at[:R, :out_features].set(L.T)
    bp = jnp.zeros((1, Np), jnp.float32).at[0, :out_features].set(
        bias.astype(jnp.float32))
    xp = jnp.zeros((Bp, x_in), jnp.float32).at[:B, :].set(x.astype(jnp.float32))

    grid = (Bp // TB, Np // TN)

    # per-grid-step VMEM footprint (double-buffered streamed operands)
    block_bytes = 4 * (TB * x_in + x_in * Rp + Rp * TN + TN + TB * TN)
    vmem_limit = int(min(2 * block_bytes + (4 << 20), 64 << 20))

    cost = pl.CostEstimate(
        flops=2 * Bp * x_in * Rp + 2 * Bp * Rp * Np,
        transcendentals=0,
        bytes_accessed=4 * (Bp * x_in + x_in * Rp + Rp * Np + Np + Bp * Np),
    )

    out_padded = pl.pallas_call(
        cp_linear_kernel,
        out_shape=jax.ShapeDtypeStruct((Bp, Np), jnp.float32),
        grid=grid,
        in_specs=[
            pl.BlockSpec((TB, x_in), lambda i, j: (i, 0)),   # activations stream
            pl.BlockSpec((x_in, Rp), lambda i, j: (0, 0)),   # K: resident
            pl.BlockSpec((Rp, TN), lambda i, j: (0, j)),     # Lt: resident per out-tile
            pl.BlockSpec((1, TN), lambda i, j: (0, j)),      # bias tile
        ],
        out_specs=pl.BlockSpec((TB, TN), lambda i, j: (i, j)),
        compiler_params=pltpu.CompilerParams(
            dimension_semantics=("parallel", "parallel"),
            vmem_limit_bytes=vmem_limit,
        ),
        cost_estimate=cost,
    )(xp, Kp, Ltp, bp)

    return out_padded[:B, :out_features].astype(x.dtype)


if __name__ == "__main__":
    # Small shapes consistent with the module:
    #   in_tensorized_features=(4, 8) -> in_features=32
    #   out_tensorized_features=(8, 8) -> out_features=64
    in_tf = (4, 8)
    out_tf = (8, 8)
    in_features = int(np.prod(in_tf))
    out_features = int(np.prod(out_tf))

    # rank='same' (tensorly convention): prod(full_shape) / sum(full_shape)
    full_shape = (*in_tf, *out_tf)
    rank = int(round(np.prod(full_shape) / np.sum(full_shape)))

    key = jax.random.PRNGKey(0)
    dims = list(in_tf) + list(out_tf)
    keys = jax.random.split(key, len(dims) + 2)

    # reset_parameters(): CP factors ~ N(0, sqrt(5)/sqrt(in_features))
    std = math.sqrt(5) / math.sqrt(in_features)
    factors = [
        std * jax.random.normal(k, (d, rank), jnp.float32)
        for k, d in zip(keys[: len(dims)], dims)
    ]
    factors_in = factors[: len(in_tf)]
    factors_out = factors[len(in_tf):]
    cp_weights = jnp.ones((rank,), jnp.float32)

    # bias ~ U(-1/sqrt(fan_in), 1/sqrt(fan_in))
    bound = 1.0 / math.sqrt(in_features)
    bias = jax.random.uniform(
        keys[len(dims)], (out_features,), jnp.float32, -bound, bound
    )

    batch = 2
    x = jax.random.normal(keys[len(dims) + 1], (batch, in_features), jnp.float32)

    y = tensorized_linear_cp_forward(x, factors_in, factors_out, cp_weights, bias)
    y = jax.block_until_ready(y)

    # plain-JAX reference: reconstruct the full weight and compare
    W = jnp.einsum(
        "r,ar,br,cr,dr->abcd",
        cp_weights, factors[0], factors[1], factors[2], factors[3],
    ).reshape(in_features, out_features)
    y_ref = x @ W + bias

    assert y.shape == (batch, out_features)
    np.testing.assert_allclose(np.asarray(y), np.asarray(y_ref), rtol=1e-4, atol=1e-4)
    print("KERNEL_OK")
</pallas_src>

<mosaic_0001>
module attributes {stable_mosaic.version = 11 : i64} {
  func.func @cp_linear_kernel(%arg0: i32, %arg1: i32, %arg2: memref<8x32xf32, #tpu.memory_space<vmem>>, %arg3: memref<32x128xf32, #tpu.memory_space<vmem>>, %arg4: memref<128x128xf32, #tpu.memory_space<vmem>>, %arg5: memref<1x128xf32, #tpu.memory_space<vmem>>, %arg6: memref<8x128xf32, #tpu.memory_space<vmem>>) attributes {dimension_semantics = [#tpu.dimension_semantics<parallel>, #tpu.dimension_semantics<parallel>], iteration_bounds = array<i64: 1, 1>, scalar_prefetch = 0 : i64, scratch_operands = 0 : i64, tpu.core_type = #tpu.core_type<tc>, window_params = [{transform_indices = @transform_0, window_bounds = array<i64: 8, 32>}, {pipeline_mode = #tpu.pipeline_mode<synchronous>, transform_indices = @transform_1, window_bounds = array<i64: 32, 128>}, {transform_indices = @transform_2, window_bounds = array<i64: 128, 128>}, {transform_indices = @transform_3, window_bounds = array<i64: 1, 128>}, {transform_indices = @transform_4, window_bounds = array<i64: 8, 128>}]} {
    %c0 = arith.constant 0 : index
    %c0_0 = arith.constant 0 : index
    %0 = vector.load %arg2[%c0, %c0_0] : memref<8x32xf32, #tpu.memory_space<vmem>>, vector<8x32xf32>
    %c0_1 = arith.constant 0 : index
    %c0_2 = arith.constant 0 : index
    %1 = vector.load %arg3[%c0_1, %c0_2] : memref<32x128xf32, #tpu.memory_space<vmem>>, vector<32x128xf32>
    %cst = arith.constant dense<0.000000e+00> : vector<8x128xf32>
    %2 = tpu.matmul %0, %1, %cst {dimension_numbers = #tpu.dot_dimension_numbers<[1], [0], [0], [1], [0, 0, 1, 1], [], []>} : vector<8x32xf32>, vector<32x128xf32>, vector<8x128xf32> -> vector<8x128xf32>
    %c0_3 = arith.constant 0 : index
    %c0_4 = arith.constant 0 : index
    %3 = vector.load %arg4[%c0_3, %c0_4] : memref<128x128xf32, #tpu.memory_space<vmem>>, vector<128x128xf32>
    %cst_5 = arith.constant dense<0.000000e+00> : vector<8x128xf32>
    %4 = tpu.matmul %2, %3, %cst_5 {dimension_numbers = #tpu.dot_dimension_numbers<[1], [0], [0], [1], [0, 0, 1, 1], [], []>} : vector<8x128xf32>, vector<128x128xf32>, vector<8x128xf32> -> vector<8x128xf32>
    %c0_6 = arith.constant 0 : index
    %c0_7 = arith.constant 0 : index
    %5 = vector.load %arg5[%c0_6, %c0_7] : memref<1x128xf32, #tpu.memory_space<vmem>>, vector<1x128xf32>
    %6 = vector.broadcast %5 : vector<1x128xf32> to vector<8x128xf32>
    %7 = arith.addf %4, %6 : vector<8x128xf32>
    %c0_8 = arith.constant 0 : index
    %c0_9 = arith.constant 0 : index
    %8 = vector.load %arg6[%c0_8, %c0_9] : memref<8x128xf32, #tpu.memory_space<vmem>>, vector<8x128xf32>
    tpu.vector_store %arg6[%c0_8, %c0_9], %7 {strides = array<i32>} : memref<8x128xf32, #tpu.memory_space<vmem>>, vector<8x128xf32>,
    return
  }
  func.func @transform_0(%arg0: i32, %arg1: i32) -> (i32, i32) {
    %c0_i32 = arith.constant 0 : i32
    %c0_i32_0 = arith.constant 0 : i32
    return %arg0, %c0_i32 : i32, i32
  }
  func.func @transform_1(%arg0: i32, %arg1: i32) -> (i32, i32) {
    %c0_i32 = arith.constant 0 : i32
    %c0_i32_0 = arith.constant 0 : i32
    %c0_i32_1 = arith.constant 0 : i32
    return %c0_i32, %c0_i32_0 : i32, i32
  }
  func.func @transform_2(%arg0: i32, %arg1: i32) -> (i32, i32) {
    %c0_i32 = arith.constant 0 : i32
    %c0_i32_0 = arith.constant 0 : i32
    return %c0_i32, %arg1 : i32, i32
  }
  func.func @transform_3(%arg0: i32, %arg1: i32) -> (i32, i32) {
    %c0_i32 = arith.constant 0 : i32
    %c0_i32_0 = arith.constant 0 : i32
    return %c0_i32, %arg1 : i32, i32
  }
  func.func @transform_4(%arg0: i32, %arg1: i32) -> (i32, i32) {
    %c0_i32 = arith.constant 0 : i32
    return %arg0, %arg1 : i32, i32
  }
}

</mosaic_0001>

<bundles_post_ra>
// kernel: tpu_custom_call.1
= control target key start
LH: loop header
LB: loop body
LE: loop exit
PB: predicated region body
PF: predicated region fallthrough
CT: control target
= control target key end

     0   :  { %9 = vsyncpa [#allocation3], 0  ;;  %s307_s0 = inlined_call_operand.hbm [shape: f32[8,32], index: 0, kind: input, shape index: {}]   ;;  %s308_s1 = inlined_call_operand.hbm [shape: f32[32,128], index: 1, kind: input, shape index: {}]   ;;  %s309_s2 = inlined_call_operand.hbm [shape: f32[128,128], index: 2, kind: input, shape index: {}]   ;;  %s310_s3 = inlined_call_operand.vmem [shape: f32[1,128], index: 3, kind: input, shape index: {}]   ;;  %s311_s4 = inlined_call_operand.hbm [shape: f32[8,128], index: 4, kind: output, shape index: {}]  }
   0x1   :  { %10 = vsyncpa [#allocation6], 0  ;;  %s27_s17 = sshll.u32 %s308_s1, 4  ;;  %s28_s17 = int_to_ptr.hbm [resolvable:$true] %s27_s17 }
   0x2   :  { %11 = vsyncpa [#allocation4], 0  ;;  %s261_s18 = smov [#allocation5]   ;;  %s17_s22 = sshll.u32 %s307_s0, 4  ;;  %s18_s22 = int_to_ptr.hbm [resolvable:$true] %s17_s22 }
   0x3   :  { %s29_s19 = sshll.u32 %s261_s18, 4  ;;  %s262_s23 = smov 128   ;;  %s30_s19 = int_to_ptr.vmem [resolvable:$true] %s29_s19 }
   0x4   :  { %s263_s24 = smov 8   ;;  %s264_s25 = smov [#allocation2]  }
   0x5   :  { %35 = dma.hbm_to_vmem [thread:$0]  %s28_s17, 512, %s30_s19, [#allocation6], %s262_s23, %s262_s23, %s263_s24  }
   0x6   :  { %s19_s26 = sshll.u32 %s264_s25, 4  ;;  %s40_s29 = sshll.u32 %s309_s2, 4  ;;  %s20_s26 = int_to_ptr.vmem [resolvable:$true] %s19_s26  ;;  %s41_s29 = int_to_ptr.hbm [resolvable:$true] %s40_s29 }
   0x7   :  { %22 = dma.hbm_to_vmem [thread:$0]  %s18_s22, 128, %s20_s26, [#allocation3]  }
   0x8   :  { %s265_s1 = smov [#allocation7]  }
   0x9   :  { %s42_s30 = sshll.u32 %s265_s1, 4  ;;  %s43_s30 = int_to_ptr.vmem [resolvable:$true] %s42_s30 }
   0xa   :  { %48 = dma.hbm_to_vmem [thread:$0]  %s41_s29, 2048, %s43_s30, [#allocation6], %s262_s23, %s262_s23, %s263_s24  }
   0xb   :  { %255 = dma.done.wait [#allocation3], 128  }
   0xc   :  { %256 = vsyncadd [#allocation3], 4294967168 }
   0xd   :  { %257 = dma.done.wait [#allocation6], 2560  }
   0xe   :  { %258 = vsyncadd [#allocation6], 4294964736  ;;  %v67_v0 = vld [vmem:[#allocation5 + $0x18] sm:$0xff]  ;;  %v66_v1 = vld [vmem:[#allocation5 + $0x10] sm:$0xff]  ;;  %vm68_vm0 = vcmask 261120   ;;  %s266_s5 = smov [#allocation8]  }
   0xf   :  { %84 = vmatpush.msra.mxu0 %v67_v0  ;;  %v107_v2 = vld [vmem:[#allocation7 + $0x78] sm:$0xff]  ;;  %v65_v3 = vld [vmem:[#allocation5 + $0x8] sm:$0xff]  ;;  %v106_v4 = vld [vmem:[#allocation7 + $0x70] sm:$0xff]  ;;  %s138_s6 = sshll.u32 %s266_s5, 4  ;;  %s140_s9 = sshll.u32 %s311_s4, 4  ;;  %s139_s6 = int_to_ptr.vmem [resolvable:$true] %s138_s6  ;;  %s141_s9 = int_to_ptr.hbm [resolvable:$true] %s140_s9 }
  0x10   :  { %112 = vmatpush.msra.mxu1 %v107_v2  ;;  %v105_v5 = vld [vmem:[#allocation7 + $0x68] sm:$0xff]  ;;  %v64_v6 = vld [vmem:[#allocation5] sm:$0xff]  ;;  %v63_v7 = vld [vmem:[#allocation2] sm:$0xff] }
  0x11   :  { %85 = vmatpush.msra.mxu0 %v66_v1  ;;  %v104_v8 = vld [vmem:[#allocation7 + $0x60] sm:$0xff]  ;;  %v103_v9 = vld [vmem:[#allocation7 + $0x58] sm:$0xff]  ;;  %v102_v10 = vld [vmem:[#allocation7 + $0x50] sm:$0xff] }
  0x12   :  { %113 = vmatpush.msra.mxu1 %v106_v4  ;;  %v101_v11 = vld [vmem:[#allocation7 + $0x48] sm:$0xff]  ;;  %v100_v12 = vld [vmem:[#allocation7 + $0x40] sm:$0xff]  ;;  %v99_v13 = vld [vmem:[#allocation7 + $0x38] sm:$0xff] }
  0x13   :  { %86 = vmatpush.msra.mxu0 %v65_v3  ;;  %v98_v14 = vld [vmem:[#allocation7 + $0x30] sm:$0xff]  ;;  %v97_v15 = vld [vmem:[#allocation7 + $0x28] sm:$0xff]  ;;  %v96_v16 = vld [vmem:[#allocation7 + $0x20] sm:$0xff] }
  0x14   :  { %114 = vmatpush.msra.mxu1 %v105_v5  ;;  %v95_v17 = vld [vmem:[#allocation7 + $0x18] sm:$0xff]  ;;  %v94_v18 = vld [vmem:[#allocation7 + $0x10] sm:$0xff]  ;;  %v93_v19 = vld [vmem:[#allocation7 + $0x8] sm:$0xff] }
  0x15   :  { %87 = vmatpush.msra.mxu0 %v64_v6  ;;  %v92_v20 = vld [vmem:[#allocation7] sm:$0xff]  ;;  %v158_v22 = vld [vmem:[%s310_s3] ss:$0 sm:$0xff] }
  0x16   :  { %151 = vmatmul.msk.f32.vlgmr.msra.gmra.mxu0 %vm68_vm0, %v63_v7  ;;  %115 = vmatpush.msra.mxu1 %v104_v8 }
  0x18   :  { %116 = vmatpush.msra.mxu1 %v103_v9 }
  0x1a   :  { %117 = vmatpush.msra.mxu1 %v102_v10 }
  0x1c   :  { %118 = vmatpush.msra.mxu1 %v101_v11 }
  0x1e   :  { %119 = vmatpush.msra.mxu1 %v100_v12 }
  0x20   :  { %120 = vmatpush.msra.mxu1 %v99_v13 }
  0x22   :  { %121 = vmatpush.msra.mxu1 %v98_v14 }
  0x24   :  { %122 = vmatpush.msra.mxu1 %v97_v15 }
  0x26   :  { %123 = vmatpush.msra.mxu1 %v96_v16 }
  0x28   :  { %124 = vmatpush.msra.mxu1 %v95_v17 }
  0x2a   :  { %125 = vmatpush.msra.mxu1 %v94_v18 }
  0x2c   :  { %126 = vmatpush.msra.mxu1 %v93_v19 }
  0x2e   :  { %127 = vmatpush.msra.mxu1 %v92_v20 }
  0x93   :  { %v89_v21 = vpop.f32.mrf.mxu0 }
  0x94   :  { %128 = vmatmul.f32.vlgmr.msra.gmra.mxu1 %v89_v21 }
 0x111   :  { %v129_v23 = vpop.f32.mrf.mxu1 }
 0x112   :  { %v130_v24 = vadd.f32 %v158_v22, %v129_v23 }
 0x114   :  { %132 = vst [vmem:[#allocation8] sm:$0xff] %v130_v24 }
 0x115   :  { %143 = dma.vmem_to_hbm [thread:$0]  %s139_s6, 128, %s141_s9, [#allocation4]  }
 0x116   :  { %259 = dma.done.wait [#allocation4], 128  }
 0x117   :  { %260 = vsyncadd [#allocation4], 4294967168 }
 0x118   :  { %148 = vsyncpa [#allocation3], 1 }
 0x119   :  { %149 = vsyncpa [#allocation6], 1 }
 0x11a   :  { %150 = vsyncpa [#allocation4], 1 }

</bundles_post_ra>
